<compile_context>
chip_gen: v7x
topology: tpu7x:2x2x1
jax: 0.10.0
libtpu: 0.0.40
codegen_flags: <defaults>
</compile_context>

<pallas_src>
from functools import partial

import numpy as np
import jax
import jax.numpy as jnp
from jax.experimental import pallas as pl
from jax.experimental.pallas import tpu as pltpu


def _round_up(a: int, b: int) -> int:
    return (a + b - 1) // b * b


def _layout(hidden_size: int, d: int) -> dict:
    """Static layout of the packed parameter slabs (shared by packer and kernel)."""
    dd = d * d
    ddd = d * dd
    tx_cols = _round_up(d + 1, 8)                 # packed [t | x | 0-pad] input row
    out_lanes = _round_up(d + dd, 128)            # lane-dense packed output row
    head_cols = 2 * ddd + dd                      # fused head emits [A | B | phi_flat]
    off_w2 = 0
    off_head = _round_up(hidden_size, 8)
    off_smean = off_head + _round_up(hidden_size, 8)
    off_ssig = off_smean + _round_up(dd, 8)
    off_trep = off_ssig + _round_up(ddd, 8)
    rows = off_trep + tx_cols
    cols = max(hidden_size, head_cols, out_lanes)
    return dict(dd=dd, ddd=ddd, tx_cols=tx_cols, out_lanes=out_lanes,
                head_cols=head_cols, off_w2=off_w2, off_head=off_head,
                off_smean=off_smean, off_ssig=off_ssig, off_trep=off_trep,
                rows=rows, cols=cols)


def pack_policy_params(params, d):
    """One-time host-side packing.

    params = (w1, b1, w2, b2, wphi, bphi, wl, bl) with weights stored
    (in_features, out_features) (i.e. torch Linear.weight transposed).
    Folds the tril scatter and the Sigma lane-expansion into the head weights and
    packs everything into two f32 slabs (matrix slab + vector slab).
    """
    w1, b1, w2, b2, wphi, bphi, wl, bl = (np.asarray(p, np.float32) for p in params)
    H = w2.shape[0]
    dd, ddd = d * d, d * d * d
    lay = _layout(H, d)

    # torch.tril_indices(d, d) ordering == np.tril_indices(d) (row-major).
    tri_r, tri_c = np.tril_indices(d)
    flat_idx = tri_r * d + tri_c
    wl_dense = np.zeros((H, dd), np.float32)
    wl_dense[:, flat_idx] = wl
    bl_dense = np.zeros((dd,), np.float32)
    bl_dense[flat_idx] = bl.reshape(-1)

    # Exact 0/1 column-scatter selectors:
    #   A[:, k*dd+i*d+j] = L[:, i, k]      B[:, k*dd+i*d+j] = L[:, j, k]
    # Group-sum selectors land mean in lanes [0, d) and Sigma in lanes [d, d+dd).
    e_a = np.zeros((dd, ddd), np.float32)
    e_b = np.zeros((dd, ddd), np.float32)
    s_mean = np.zeros((dd, lay["out_lanes"]), np.float32)
    s_sig = np.zeros((ddd, lay["out_lanes"]), np.float32)
    for i in range(d):
        for j in range(d):
            s_mean[i * d + j, i] = 1.0
            for k in range(d):
                col = k * dd + i * d + j
                e_a[i * d + k, col] = 1.0
                e_b[j * d + k, col] = 1.0
                s_sig[col, d + i * d + j] = 1.0

    # Fused output head: one matmul emits [A | B | phi_flat] directly
    # (phi head, L head, tril scatter and lane expansion all folded in).
    w_head = np.concatenate([wl_dense @ e_a, wl_dense @ e_b, wphi], axis=1)
    b_head = np.concatenate([bl_dense @ e_a, bl_dense @ e_b, bphi.reshape(-1)])

    # Selector that tiles x (read out of the packed [t | x] row) d times along lanes.
    t_rep = np.zeros((lay["tx_cols"], dd), np.float32)
    for i in range(d):
        for j in range(d):
            t_rep[1 + j, i * d + j] = 1.0

    out_bias = np.zeros((lay["out_lanes"],), np.float32)
    out_bias[d + np.arange(d) * (d + 1)] = 0.001          # + 0.001 * I on the Sigma diagonal

    mats = np.zeros((lay["rows"], lay["cols"]), np.float32)
    mats[lay["off_w2"]:lay["off_w2"] + H, 0:H] = w2
    mats[lay["off_head"]:lay["off_head"] + H, 0:lay["head_cols"]] = w_head
    mats[lay["off_smean"]:lay["off_smean"] + dd, 0:lay["out_lanes"]] = s_mean
    mats[lay["off_ssig"]:lay["off_ssig"] + ddd, 0:lay["out_lanes"]] = s_sig
    mats[lay["off_trep"]:lay["off_trep"] + lay["tx_cols"], 0:dd] = t_rep

    vecs = np.zeros((8, lay["cols"]), np.float32)
    vecs[0, 0:H] = w1.reshape(-1)
    vecs[1, 0:H] = b1.reshape(-1)
    vecs[2, 0:H] = b2.reshape(-1)
    vecs[3, 0:lay["head_cols"]] = b_head
    vecs[4, 0:lay["out_lanes"]] = out_bias
    return jnp.asarray(mats), jnp.asarray(vecs)


def _policy_kernel(H, d, lay, tx_ref, mats_ref, vecs_ref, out_ref):
    """One batch tile (TB samples). All matmuls put the batch on the MXU M dim."""
    f32 = jnp.float32
    dd, ddd = lay["dd"], lay["ddd"]
    hc, ol = lay["head_cols"], lay["out_lanes"]

    tx = tx_ref[...]                                   # (TB, tx_cols): col 0 = t, cols 1..d = x
    t = tx[:, 0:1]                                     # (TB, 1)

    w1 = vecs_ref[0:1, 0:H]
    b1 = vecs_ref[1:2, 0:H]
    b2 = vecs_ref[2:3, 0:H]
    b_head = vecs_ref[3:4, 0:hc]
    out_bias = vecs_ref[4:5, 0:ol]

    w2 = mats_ref[lay["off_w2"]:lay["off_w2"] + H, 0:H]
    w_head = mats_ref[lay["off_head"]:lay["off_head"] + H, 0:hc]
    s_mean = mats_ref[lay["off_smean"]:lay["off_smean"] + dd, 0:ol]
    s_sig = mats_ref[lay["off_ssig"]:lay["off_ssig"] + ddd, 0:ol]
    t_rep = mats_ref[lay["off_trep"]:lay["off_trep"] + lay["tx_cols"], 0:dd]

    # hidden_layer1: Linear(1 -> H) + ReLU  (in_features == 1 -> broadcast multiply).
    h1 = jnp.maximum(t * w1 + b1, 0.0)                                    # (TB, H)

    # hidden_layer2: Linear(H -> H) + sigmoid (exact, single EUP tanh, no divide).
    z2 = jnp.dot(h1, w2, preferred_element_type=f32) + b2
    h2 = 0.5 * jnp.tanh(0.5 * z2) + 0.5                                   # (TB, H)

    # Fused output head: head = [A | B | phi_flat] with
    #   A[:, k*dd+i*d+j] = L[b, i, k]   and   B[:, k*dd+i*d+j] = L[b, j, k].
    head = jnp.dot(h2, w_head, preferred_element_type=f32) + b_head       # (TB, 2*d^3 + d^2)
    a_all = head[:, 0:ddd]
    b_all = head[:, ddd:2 * ddd]
    phi_flat = head[:, 2 * ddd:2 * ddd + dd]

    # x tiled d times along lanes: x_tiled[:, i*d + j] = x[:, j].
    x_tiled = jnp.dot(tx, t_rep, preferred_element_type=f32)              # (TB, d^2)

    # mean[b, i]     = sum_j phi[b, i, j] * x[b, j]           -> output lanes [0, d)
    # Sigma[b, i, j] = sum_k L[b, i, k] * L[b, j, k] + eps     -> output lanes [d, d + d^2)
    out_ref[...] = (
        jnp.dot(phi_flat * x_tiled, s_mean, preferred_element_type=f32)
        + jnp.dot(a_all * b_all, s_sig, preferred_element_type=f32)
        + out_bias)


@partial(jax.jit, static_argnames=("hidden_size", "block_b"))
def policy_forward(t, x, mats, vecs, *, hidden_size, block_b=128):
    """Batched forward. Returns (mean (B, d), Sigma (d, d) if B == 1 else (B, d, d))."""
    B, d = x.shape
    lay = _layout(hidden_size, d)
    dd = d * d

    # block_b = 128 fills a v5e MXU pass; 256 fills the 256-wide MXU on v6e/v7x.
    tb = min(block_b, _round_up(B, 8))
    bp = _round_up(B, tb)

    # Pack t and x into one lane-padded payload row (single per-sample input stream).
    tx = jnp.concatenate([t.reshape(-1, 1), x], axis=1).astype(jnp.float32)   # (B, d+1)
    tx = jnp.pad(tx, ((0, bp - B), (0, lay["tx_cols"] - (d + 1))))

    kernel = partial(_policy_kernel, hidden_size, d, lay)
    packed = pl.pallas_call(
        kernel,
        out_shape=jax.ShapeDtypeStruct((bp, lay["out_lanes"]), jnp.float32),
        grid_spec=pltpu.PrefetchScalarGridSpec(
            num_scalar_prefetch=0,
            grid=(bp // tb,),
            in_specs=[
                pl.BlockSpec((tb, lay["tx_cols"]), lambda i: (i, 0)),
                pl.BlockSpec(tuple(mats.shape), lambda i: (0, 0)),   # VMEM-resident weights
                pl.BlockSpec(tuple(vecs.shape), lambda i: (0, 0)),   # VMEM-resident biases
            ],
            out_specs=pl.BlockSpec((tb, lay["out_lanes"]), lambda i: (i, 0)),
        ),
        compiler_params=pltpu.CompilerParams(
            dimension_semantics=("parallel",)),       # v7x: batch axis sharded over both TCs
    )(tx, mats, vecs)

    mean = packed[:B, 0:d]
    sigma = packed[:B, d:d + dd].reshape(B, d, d)
    if B == 1:
        # Exact original-module semantics: a single (d, d) Sigma.
        return mean, sigma[0]
    return mean, sigma


def reference_forward(t, x, params, d):
    """Pure-JAX reference (per-sample generalization of the torch forward)."""
    w1, b1, w2, b2, wphi, bphi, wl, bl = params
    B = x.shape[0]
    tri_r, tri_c = np.tril_indices(d)
    t2 = t.reshape(-1, 1)
    h1 = jnp.maximum(t2 @ w1 + b1, 0.0)
    h2 = jax.nn.sigmoid(h1 @ w2 + b2)
    phi = (h2 @ wphi + bphi).reshape(B, d, d)
    l_flat = h2 @ wl + bl
    L = jnp.zeros((B, d, d), jnp.float32).at[:, tri_r, tri_c].set(l_flat)
    sigma = jnp.einsum('bik,bjk->bij', L, L) + 0.001 * jnp.eye(d, dtype=jnp.float32)
    mean = jnp.einsum('bij,bj->bi', phi, x)
    return mean, sigma


if __name__ == "__main__":
    hidden_size, d, B = 32, 4, 256
    m = d * (d + 1) // 2

    key = jax.random.PRNGKey(0)
    ks = jax.random.split(key, 10)
    # Deterministic synthetic parameters, weights stored (in_features, out_features).
    w1 = jax.random.normal(ks[0], (1, hidden_size), jnp.float32) * 0.5
    b1 = jax.random.normal(ks[1], (1, hidden_size), jnp.float32) * 0.1
    w2 = jax.random.normal(ks[2], (hidden_size, hidden_size), jnp.float32) * 0.2
    b2 = jax.random.normal(ks[3], (1, hidden_size), jnp.float32) * 0.1
    wphi = jax.random.normal(ks[4], (hidden_size, d * d), jnp.float32) * 0.2
    bphi = jax.random.normal(ks[5], (1, d * d), jnp.float32) * 0.1
    wl = jax.random.normal(ks[6], (hidden_size, m), jnp.float32) * 0.2
    bl = jax.random.normal(ks[7], (1, m), jnp.float32) * 0.1
    params = (w1, b1, w2, b2, wphi, bphi, wl, bl)

    t = jax.random.uniform(ks[8], (B,), jnp.float32)
    x = jax.random.normal(ks[9], (B, d), jnp.float32)

    # Host-side packing done once (folds tril scatter + lane expansion into the weights).
    mats, vecs = pack_policy_params(params, d)

    # Batched call: the whole batch goes through one pallas_call (grid of 128-row tiles).
    mean, sigma = policy_forward(t, x, mats, vecs, hidden_size=hidden_size)
    mean, sigma = jax.block_until_ready((mean, sigma))

    mean_ref, sigma_ref = reference_forward(t, x, params, d)
    np.testing.assert_allclose(np.asarray(mean), np.asarray(mean_ref), rtol=2e-5, atol=2e-5)
    np.testing.assert_allclose(np.asarray(sigma), np.asarray(sigma_ref), rtol=2e-5, atol=2e-5)

    # Single-sample call reproduces the original module exactly (Sigma is (d, d)).
    mean1, sigma1 = policy_forward(t[:1], x[:1], mats, vecs, hidden_size=hidden_size)
    mean1, sigma1 = jax.block_until_ready((mean1, sigma1))
    np.testing.assert_allclose(np.asarray(mean1), np.asarray(mean_ref[:1]), rtol=2e-5, atol=2e-5)
    np.testing.assert_allclose(np.asarray(sigma1), np.asarray(sigma_ref[0]), rtol=2e-5, atol=2e-5)

    print("KERNEL_OK")
</pallas_src>

<mosaic_0001>
module attributes {stable_mosaic.version = 11 : i64} {
  func.func @_policy_kernel(%arg0: i32, %arg1: memref<128x8xf32, #tpu.memory_space<vmem>>, %arg2: memref<152x144xf32, #tpu.memory_space<vmem>>, %arg3: memref<8x144xf32, #tpu.memory_space<vmem>>, %arg4: memref<128x128xf32, #tpu.memory_space<vmem>>) attributes {dimension_semantics = [#tpu.dimension_semantics<parallel>], iteration_bounds = array<i64: 2>, scalar_prefetch = 0 : i64, scratch_operands = 0 : i64, tpu.core_type = #tpu.core_type<tc>, window_params = [{transform_indices = @transform_0, window_bounds = array<i64: 128, 8>}, {pipeline_mode = #tpu.pipeline_mode<synchronous>, transform_indices = @transform_1, window_bounds = array<i64: 152, 144>}, {pipeline_mode = #tpu.pipeline_mode<synchronous>, transform_indices = @transform_2, window_bounds = array<i64: 8, 144>}, {transform_indices = @transform_3, window_bounds = array<i64: 128, 128>}]} {
    %c0 = arith.constant 0 : index
    %c0_0 = arith.constant 0 : index
    %0 = vector.load %arg1[%c0, %c0_0] : memref<128x8xf32, #tpu.memory_space<vmem>>, vector<128x8xf32>
    %1 = vector.extract_strided_slice %0 {offsets = [0, 0], sizes = [128, 1], strides = [1, 1]} : vector<128x8xf32> to vector<128x1xf32>
    %c0_1 = arith.constant 0 : index
    %c0_2 = arith.constant 0 : index
    %2 = vector.load %arg3[%c0_1, %c0_2] : memref<8x144xf32, #tpu.memory_space<vmem>>, vector<1x32xf32>
    %c1 = arith.constant 1 : index
    %c0_3 = arith.constant 0 : index
    %3 = vector.load %arg3[%c1, %c0_3] : memref<8x144xf32, #tpu.memory_space<vmem>>, vector<1x32xf32>
    %c2 = arith.constant 2 : index
    %c0_4 = arith.constant 0 : index
    %4 = vector.load %arg3[%c2, %c0_4] : memref<8x144xf32, #tpu.memory_space<vmem>>, vector<1x32xf32>
    %c3 = arith.constant 3 : index
    %c0_5 = arith.constant 0 : index
    %5 = vector.load %arg3[%c3, %c0_5] : memref<8x144xf32, #tpu.memory_space<vmem>>, vector<1x144xf32>
    %c4 = arith.constant 4 : index
    %c0_6 = arith.constant 0 : index
    %6 = vector.load %arg3[%c4, %c0_6] : memref<8x144xf32, #tpu.memory_space<vmem>>, vector<1x128xf32>
    %c0_7 = arith.constant 0 : index
    %c0_8 = arith.constant 0 : index
    %7 = vector.load %arg2[%c0_7, %c0_8] : memref<152x144xf32, #tpu.memory_space<vmem>>, vector<32x32xf32>
    %c32 = arith.constant 32 : index
    %c0_9 = arith.constant 0 : index
    %8 = vector.load %arg2[%c32, %c0_9] : memref<152x144xf32, #tpu.memory_space<vmem>>, vector<32x144xf32>
    %c64 = arith.constant 64 : index
    %c0_10 = arith.constant 0 : index
    %9 = vector.load %arg2[%c64, %c0_10] : memref<152x144xf32, #tpu.memory_space<vmem>>, vector<16x128xf32>
    %c80 = arith.constant 80 : index
    %c0_11 = arith.constant 0 : index
    %10 = vector.load %arg2[%c80, %c0_11] : memref<152x144xf32, #tpu.memory_space<vmem>>, vector<64x128xf32>
    %c144 = arith.constant 144 : index
    %c0_12 = arith.constant 0 : index
    %11 = vector.load %arg2[%c144, %c0_12] : memref<152x144xf32, #tpu.memory_space<vmem>>, vector<8x16xf32>
    %12 = vector.broadcast %1 : vector<128x1xf32> to vector<128x32xf32>
    %13 = vector.broadcast %2 : vector<1x32xf32> to vector<128x32xf32>
    %14 = arith.mulf %12, %13 : vector<128x32xf32>
    %15 = vector.broadcast %3 : vector<1x32xf32> to vector<128x32xf32>
    %16 = arith.addf %14, %15 : vector<128x32xf32>
    %cst = arith.constant 0.000000e+00 : f32
    %17 = vector.broadcast %cst : f32 to vector<128x32xf32>
    %18 = arith.maximumf %16, %17 : vector<128x32xf32>
    %cst_13 = arith.constant dense<0.000000e+00> : vector<128x32xf32>
    %19 = tpu.matmul %18, %7, %cst_13 {dimension_numbers = #tpu.dot_dimension_numbers<[1], [0], [0], [1], [0, 0, 1, 1], [], []>} : vector<128x32xf32>, vector<32x32xf32>, vector<128x32xf32> -> vector<128x32xf32>
    %20 = vector.broadcast %4 : vector<1x32xf32> to vector<128x32xf32>
    %21 = arith.addf %19, %20 : vector<128x32xf32>
    %cst_14 = arith.constant 5.000000e-01 : f32
    %22 = vector.broadcast %cst_14 : f32 to vector<128x32xf32>
    %23 = arith.mulf %22, %21 : vector<128x32xf32>
    %24 = math.tanh %23 : vector<128x32xf32>
    %cst_15 = arith.constant 5.000000e-01 : f32
    %25 = vector.broadcast %cst_15 : f32 to vector<128x32xf32>
    %26 = arith.mulf %25, %24 : vector<128x32xf32>
    %cst_16 = arith.constant 5.000000e-01 : f32
    %27 = vector.broadcast %cst_16 : f32 to vector<128x32xf32>
    %28 = arith.addf %26, %27 : vector<128x32xf32>
    %cst_17 = arith.constant dense<0.000000e+00> : vector<128x144xf32>
    %29 = tpu.matmul %28, %8, %cst_17 {dimension_numbers = #tpu.dot_dimension_numbers<[1], [0], [0], [1], [0, 0, 1, 1], [], []>} : vector<128x32xf32>, vector<32x144xf32>, vector<128x144xf32> -> vector<128x144xf32>
    %30 = vector.broadcast %5 : vector<1x144xf32> to vector<128x144xf32>
    %31 = arith.addf %29, %30 : vector<128x144xf32>
    %32 = vector.extract_strided_slice %31 {offsets = [0, 0], sizes = [128, 64], strides = [1, 1]} : vector<128x144xf32> to vector<128x64xf32>
    %33 = vector.extract_strided_slice %31 {offsets = [0, 64], sizes = [128, 64], strides = [1, 1]} : vector<128x144xf32> to vector<128x64xf32>
    %34 = vector.extract_strided_slice %31 {offsets = [0, 128], sizes = [128, 16], strides = [1, 1]} : vector<128x144xf32> to vector<128x16xf32>
    %cst_18 = arith.constant dense<0.000000e+00> : vector<128x16xf32>
    %35 = tpu.matmul %0, %11, %cst_18 {dimension_numbers = #tpu.dot_dimension_numbers<[1], [0], [0], [1], [0, 0, 1, 1], [], []>} : vector<128x8xf32>, vector<8x16xf32>, vector<128x16xf32> -> vector<128x16xf32>
    %36 = arith.mulf %34, %35 : vector<128x16xf32>
    %cst_19 = arith.constant dense<0.000000e+00> : vector<128x128xf32>
    %37 = tpu.matmul %36, %9, %cst_19 {dimension_numbers = #tpu.dot_dimension_numbers<[1], [0], [0], [1], [0, 0, 1, 1], [], []>} : vector<128x16xf32>, vector<16x128xf32>, vector<128x128xf32> -> vector<128x128xf32>
    %38 = arith.mulf %32, %33 : vector<128x64xf32>
    %cst_20 = arith.constant dense<0.000000e+00> : vector<128x128xf32>
    %39 = tpu.matmul %38, %10, %cst_20 {dimension_numbers = #tpu.dot_dimension_numbers<[1], [0], [0], [1], [0, 0, 1, 1], [], []>} : vector<128x64xf32>, vector<64x128xf32>, vector<128x128xf32> -> vector<128x128xf32>
    %40 = arith.addf %37, %39 : vector<128x128xf32>
    %41 = vector.broadcast %6 : vector<1x128xf32> to vector<128x128xf32>
    %42 = arith.addf %40, %41 : vector<128x128xf32>
    %c0_21 = arith.constant 0 : index
    %c0_22 = arith.constant 0 : index
    %43 = vector.load %arg4[%c0_21, %c0_22] : memref<128x128xf32, #tpu.memory_space<vmem>>, vector<128x128xf32>
    tpu.vector_store %arg4[%c0_21, %c0_22], %42 {strides = array<i32>} : memref<128x128xf32, #tpu.memory_space<vmem>>, vector<128x128xf32>,
    return
  }
  func.func @transform_0(%arg0: i32) -> (i32, i32) {
    %c0_i32 = arith.constant 0 : i32
    %c0_i32_0 = arith.constant 0 : i32
    return %arg0, %c0_i32 : i32, i32
  }
  func.func @transform_1(%arg0: i32) -> (i32, i32) {
    %c0_i32 = arith.constant 0 : i32
    %c0_i32_0 = arith.constant 0 : i32
    %c0_i32_1 = arith.constant 0 : i32
    return %c0_i32, %c0_i32_0 : i32, i32
  }
  func.func @transform_2(%arg0: i32) -> (i32, i32) {
    %c0_i32 = arith.constant 0 : i32
    %c0_i32_0 = arith.constant 0 : i32
    %c0_i32_1 = arith.constant 0 : i32
    return %c0_i32, %c0_i32_0 : i32, i32
  }
  func.func @transform_3(%arg0: i32) -> (i32, i32) {
    %c0_i32 = arith.constant 0 : i32
    %c0_i32_0 = arith.constant 0 : i32
    return %arg0, %c0_i32 : i32, i32
  }
}

</mosaic_0001>

<bundles_post_ra>
// kernel: policy_forward.1
= control target key start
LH: loop header
LB: loop body
LE: loop exit
PB: predicated region body
PF: predicated region fallthrough
CT: control target
= control target key end

     0   :  { %s2000_s12 = smov 0   ;;  %s2549_s0 = inlined_call_operand.vmem [shape: f32[256,8], index: 0, kind: input, shape index: {}]   ;;  %s2550_s1 = inlined_call_operand.vmem [shape: f32[152,144], index: 1, kind: input, shape index: {}]   ;;  %s2551_s2 = inlined_call_operand.vmem [shape: f32[8,144], index: 2, kind: input, shape index: {}]   ;;  %s2552_s3 = inlined_call_operand.vmem [shape: f32[256,128], index: 3, kind: output, shape index: {}]  }
   0x1 LB: > { %s1575_s13 = sadd.s32 4294967295, %s1975_s12   ;;  %p1579_p0 = scmp.ge.s32.totalorder %s1975_s12, 1  ;;  %s1975_s12 = sphi %s2000_s12, %s13_s12  }
   0x2   : > { %p138_p1 = scmp.lt.s32.totalorder %s1975_s12, 3 }
   0x4   : > { %p139_p2 = pnand %p1579_p0, %p138_p1 }
   0x5   : > { %s1580_s14 = sshll.u32 (!%p139_p2), %s1575_s13, 4  ;;  %v1977_v0 = vmov (!%p139_p2), 0   ;;  %v196_v6 = vld [vmem:[%s2550_s1] sm:$0xff] (!%p139_p2)  ;;  %v197_v7 = vld [vmem:[%s2550_s1 + $0x10] sm:$0xff] (!%p139_p2)  ;;  %v201_v23 = vld [vmem:[%s2550_s1 + $0x48] sm:$0xff] (!%p139_p2)  ;;  %vm347_vm0 = vcmask (!%p139_p2), 261120  }
   0x6   : > { %142 = sbr.rel (%p139_p2) target bundleno = 1026 (0x402), region = 32  ;;  %1936 = vset.pattern.permute.xlu1 (!%p139_p2), %v1977_v0  ;;  %1935 = vset.pattern.permute.xlu0 (!%p139_p2), %v1977_v0  ;;  %p163_p3 = scmp.lt.s32.totalorder (!%p139_p2), %s1580_s14, 31  ;;  %v1872_v9 = vpack.c.bf16 (!%p139_p2), %v197_v7, %v196_v6  ;;  %v198_v10 = vld [vmem:[%s2550_s1 + $0x20] sm:$0xff] (!%p139_p2)  ;;  %v199_v11 = vld [vmem:[%s2550_s1 + $0x30] sm:$0xff] (!%p139_p2)  ;;  %v203_v24 = vld [vmem:[%s2550_s1 + $0x58] sm:$0xff] (!%p139_p2)  ;;  %vm825_vm1 = vcmask (!%p139_p2), 64512  }
   0x7   : > { %v1876_v12 = vpack.c.bf16 (!%p139_p2), %v199_v11, %v198_v10  ;;  %v1880_v25 = vpack.c.bf16 (!%p139_p2), %v203_v24, %v201_v23  ;;  %v2103_v26 = vld [vmem:[%s2551_s2] ss:$0 sm:$0xff] (!%p139_p2)  ;;  %v2108_v27 = vld [vmem:[%s2551_s2 + $0x1] ss:$0 sm:$0xff] (!%p139_p2)  ;;  %v202_v40 = vld [vmem:[%s2550_s1 + $0x50] sm:$0xff] (!%p139_p2)  ;;  %s1979_s21 = smov (!%p139_p2), 64  }
   0x8   : > { %1873 = vmatprep.subr.bf16.mxu1 (!%p139_p2), %v1872_v9  ;;  %v200_v39 = vld [vmem:[%s2550_s1 + $0x40] sm:$0xff] (!%p139_p2)  ;;  %vm1099_vm2 = vcmask (!%p139_p2), 523264   ;;  %vm1293_vm3 = vcmask (!%p139_p2), 130048  }
   0x9   : > { %1875 = vmatpush3.bf16.msra.mxu1 (!%p139_p2), %v1872_v9  ;;  %v1882_v46 = vpack.c.bf16 (!%p139_p2), %v202_v40, %v200_v39 }
   0xa   : > { %1877 = vmatprep.subr.bf16.mxu1 (!%p139_p2), %v1876_v12 }
   0xd   : > { %s2554_s14 = smov (!%p163_p3, %s1580_s14), 31  ;;  %1879 = vmatpush3.bf16.msra.mxu1 %v1876_v12 }
   0xe   : > { %s1581_s15 = sshll.u32 %s2554_s14, 3  ;;  %1881 = vmatprep.subr.bf16.mxu1 %v1880_v25 }
   0xf   : > { %s2016_s18 = scalar_lea.vmem %s2549_s0, %s1581_s15  ;;  %s2528_s30 = scalar_lea.vmem %s2552_s3, %s1581_s15 }
  0x10   : > { %v2019_v1 = vld [vmem:[%s2016_s18 + $0x10] sm:$0xff]  ;;  %v2022_v2 = vld [vmem:[%s2016_s18] sm:$0xff]  ;;  %v2027_v3 = vld [vmem:[%s2016_s18 + $0x18] sm:$0xff] }
  0x11   : > { %231 = vperm.xlu1 %1936, %v2019_v1   ;;  %221 = vperm.xlu0 %1935, %v2022_v2   ;;  %v2030_v4 = vld [vmem:[%s2016_s18 + $0x8] sm:$0xff]  ;;  %v2044_v8 = vld [vmem:[%s2016_s18 + $0x20] sm:$0xff]  ;;  %v2055_v13 = vld [vmem:[%s2016_s18 + $0x38] sm:$0xff] }
  0x12   : > { %v2035_v5 = vld [vmem:[%s2016_s18 + $0x28] sm:$0xff]  ;;  %v2058_v14 = vld [vmem:[%s2016_s18 + $0x30] sm:$0xff]  ;;  %v2066_v16 = vld [vmem:[%s2016_s18 + $0x40] sm:$0xff]  ;;  %1780 = vmatprep.mubr.msk.f32.mxu0 %vm825_vm1, %v2022_v2 }
  0x13   : > { %v2063_v15 = vld [vmem:[%s2016_s18 + $0x48] sm:$0xff]  ;;  %v2071_v17 = vld [vmem:[%s2016_s18 + $0x58] sm:$0xff]  ;;  %v2074_v18 = vld [vmem:[%s2016_s18 + $0x50] sm:$0xff] }
  0x14   : > { %v2079_v19 = vld [vmem:[%s2016_s18 + $0x68] sm:$0xff]  ;;  %v2082_v20 = vld [vmem:[%s2016_s18 + $0x60] sm:$0xff]  ;;  %v2087_v21 = vld [vmem:[%s2016_s18 + $0x78] sm:$0xff] }
  0x15   : > { %236 = vperm.xlu1 %1936, %v2027_v3   ;;  %226 = vperm.xlu0 %1935, %v2030_v4   ;;  %v2090_v22 = vld [vmem:[%s2016_s18 + $0x70] sm:$0xff] }
  0x19   : > { %246 = vperm.xlu1 %1936, %v2035_v5   ;;  %241 = vperm.xlu0 %1935, %v2044_v8  }
  0x1d   : > { %256 = vperm.xlu1 %1936, %v2055_v13   ;;  %251 = vperm.xlu0 %1935, %v2058_v14  }
  0x21   : > { %266 = vperm.xlu1 %1936, %v2063_v15   ;;  %261 = vperm.xlu0 %1935, %v2066_v16  }
  0x25   : > { %276 = vperm.xlu1 %1936, %v2071_v17   ;;  %271 = vperm.xlu0 %1935, %v2074_v18  }
  0x29   : > { %286 = vperm.xlu1 %1936, %v2079_v19   ;;  %281 = vperm.xlu0 %1935, %v2082_v20  }
  0x2d   : > { %296 = vperm.xlu1 %1936, %v2087_v21   ;;  %291 = vperm.xlu0 %1935, %v2090_v22  }
  0x90   : > { %v232_v28 = vpop.permute.xlu1 %231  ;;  %v222_v29 = vpop.permute.xlu0 %221 }
  0x91   : > { %v301_v30 = vmul.f32 %v232_v28, %v2103_v26  ;;  %v299_v31 = vmul.f32 %v222_v29, %v2103_v26 }
  0x93   : > { %v315_v32 = vadd.f32 %v299_v31, %v2108_v27  ;;  %v317_v33 = vadd.f32 %v301_v30, %v2108_v27 }
  0x94   : > { %v237_v34 = vpop.permute.xlu1 %236  ;;  %v227_v35 = vpop.permute.xlu0 %226 }
  0x95   : > { %v302_v36 = vmul.f32 %v237_v34, %v2103_v26  ;;  %v300_v37 = vmul.f32 %v227_v35, %v2103_v26  ;;  %v331_v38 = vmax.f32 %v315_v32, 0.0  ;;  %v333_v43 = vmax.f32 %v317_v33, 0.0 }
  0x97   : > { %v318_v41 = vadd.f32 %v302_v36, %v2108_v27  ;;  %v316_v42 = vadd.f32 %v300_v37, %v2108_v27  ;;  %1754 = vmatprep.mubr.msk.f32.mxu1 %vm347_vm0, %v331_v38 }
  0x98   : > { %v247_v44 = vpop.permute.xlu1 %246  ;;  %v242_v45 = vpop.permute.xlu0 %241 }
  0x99   : > { %v332_v47 = vmax.f32 %v316_v42, 0.0  ;;  %v304_v48 = vmul.f32 %v247_v44, %v2103_v26  ;;  %v303_v49 = vmul.f32 %v242_v45, %v2103_v26  ;;  %v334_v50 = vmax.f32 %v318_v41, 0.0 }
  0x9b   : > { %v319_v51 = vadd.f32 %v303_v49, %v2108_v27  ;;  %1755 = vmatmul.mubr.msk.f32.vlgmr.msra.gmra.mrb[0].mxu1 %vm347_vm0, %v332_v47  ;;  %v320_v54 = vadd.f32 %v304_v48, %v2108_v27  ;;  %v207_v49 = vld [vmem:[%s2550_s1 + $0x78] sm:$0xff] }
  0x9c   : > { %v257_v52 = vpop.permute.xlu1 %256  ;;  %v252_v53 = vpop.permute.xlu0 %251  ;;  %1757 = vmatprep.mubr.msk.f32.mxu1 %vm347_vm0, %v333_v43  ;;  %1883 = vmatpush1.bf16.msra.mxu1 %v1882_v46 }
  0x9d   : > { %v335_v55 = vmax.f32 %v319_v51, 0.0  ;;  %v306_v56 = vmul.f32 %v257_v52, %v2103_v26  ;;  %v305_v57 = vmul.f32 %v252_v53, %v2103_v26  ;;  %v336_v62 = vmax.f32 %v320_v54, 0.0  ;;  %v206_v51 = vld [vmem:[%s2550_s1 + $0x70] sm:$0xff]  ;;  %v218_v54 = vld [vmem:[%s2550_s1 + $0x120] sm:$0xff] }
  0x9e   : > { %v1978_v53 = vmov 0.0   ;;  %1778 = vmatprep.subr.mxu0 %v218_v54 }
  0x9f   : > { %v321_v58 = vadd.f32 %v305_v57, %v2108_v27  ;;  %1758 = vmatmul.mubr.msk.f32.gmra.mrb[2].mxu1 %vm347_vm0, %v334_v50  ;;  %v322_v59 = vadd.f32 %v306_v56, %v2108_v27  ;;  %1779 = vmatpush3.msra.mxu0 %v218_v54 }
  0xa0   : > { %v267_v60 = vpop.permute.xlu1 %266  ;;  %1760 = vmatprep.mubr.msk.f32.mxu1 %vm347_vm0, %v335_v55  ;;  %v262_v61 = vpop.permute.xlu0 %261  ;;  %1781 = vmatmul.mubr.msk.f32.vlgmr.msra.gmra.mrb[0].mxu0 %vm825_vm1, %v2030_v4 }
  0xa1   : > { %v337_v63 = vmax.f32 %v321_v58, 0.0  ;;  %v308_v0 = vmul.f32 %v267_v60, %v2103_v26  ;;  %v307_v6 = vmul.f32 %v262_v61, %v2103_v26  ;;  %v338_v9 = vmax.f32 %v322_v59, 0.0  ;;  %1783 = vmatprep.mubr.msk.f32.mxu0 %vm825_vm1, %v2019_v1  ;;  %v2215_v1 = vld [vmem:[%s2551_s2 + $0x2] ss:$0 sm:$0xff] }
  0xa3   : > { %v323_v7 = vadd.f32 %v307_v6, %v2108_v27  ;;  %1761 = vmatmul.mubr.msk.f32.gmra.mrb[4].mxu1 %vm347_vm0, %v336_v62  ;;  %v324_v12 = vadd.f32 %v308_v0, %v2108_v27 }
  0xa4   : > { %v277_v10 = vpop.permute.xlu1 %276  ;;  %1763 = vmatprep.mubr.msk.f32.mxu1 %vm347_vm0, %v337_v63  ;;  %v272_v11 = vpop.permute.xlu0 %271  ;;  %1784 = vmatmul.mubr.msk.f32.gmra.mrb[2].mxu0 %vm825_vm1, %v2027_v3 }
  0xa5   : > { %v339_v23 = vmax.f32 %v323_v7, 0.0  ;;  %v310_v24 = vmul.f32 %v277_v10, %v2103_v26  ;;  %v309_v25 = vmul.f32 %v272_v11, %v2103_v26  ;;  %v340_v32 = vmax.f32 %v324_v12, 0.0  ;;  %1786 = vmatprep.mubr.msk.f32.mxu0 %vm825_vm1, %v2044_v8 }
  0xa7   : > { %v325_v28 = vadd.f32 %v309_v25, %v2108_v27  ;;  %1764 = vmatmul.mubr.msk.f32.gmra.mrb[6].mxu1 %vm347_vm0, %v338_v9  ;;  %v326_v29 = vadd.f32 %v310_v24, %v2108_v27 }
  0xa8   : > { %v287_v30 = vpop.permute.xlu1 %286  ;;  %1766 = vmatprep.mubr.msk.f32.mxu1 %vm347_vm0, %v339_v23  ;;  %v282_v31 = vpop.permute.xlu0 %281  ;;  %1787 = vmatmul.mubr.msk.f32.gmra.mrb[4].mxu0 %vm825_vm1, %v2035_v5 }
  0xa9   : > { %v341_v33 = vmax.f32 %v325_v28, 0.0  ;;  %v312_v34 = vmul.f32 %v287_v30, %v2103_v26  ;;  %v311_v35 = vmul.f32 %v282_v31, %v2103_v26  ;;  %v342_v37 = vmax.f32 %v326_v29, 0.0  ;;  %1789 = vmatprep.mubr.msk.f32.mxu0 %vm825_vm1, %v2058_v14 }
  0xab   : > { %v327_v36 = vadd.f32 %v311_v35, %v2108_v27  ;;  %1767 = vmatmul.mubr.msk.f32.gmra.mrb[8].mxu1 %vm347_vm0, %v340_v32  ;;  %v328_v40 = vadd.f32 %v312_v34, %v2108_v27 }
  0xac   : > { %v297_v38 = vpop.permute.xlu1 %296  ;;  %1769 = vmatprep.mubr.msk.f32.mxu1 %vm347_vm0, %v341_v33  ;;  %v292_v39 = vpop.permute.xlu0 %291  ;;  %1790 = vmatmul.mubr.msk.f32.gmra.mrb[6].mxu0 %vm825_vm1, %v2055_v13 }
  0xad   : > { %v343_v41 = vmax.f32 %v327_v36, 0.0  ;;  %v314_v42 = vmul.f32 %v297_v38, %v2103_v26  ;;  %v313_v43 = vmul.f32 %v292_v39, %v2103_v26  ;;  %v344_v45 = vmax.f32 %v328_v40, 0.0  ;;  %v205_v26 = vld [vmem:[%s2550_s1 + $0x68] sm:$0xff]  ;;  %1792 = vmatprep.mubr.msk.f32.mxu0 %vm825_vm1, %v2066_v16 }
  0xae   : > { %v1884_v50 = vpack.c.bf16 %v207_v49, %v205_v26 }
  0xaf   : > { %v329_v44 = vadd.f32 %v313_v43, %v2108_v27  ;;  %1770 = vmatmul.mubr.msk.f32.gmra.mrb[10].mxu1 %vm347_vm0, %v342_v37  ;;  %v330_v46 = vadd.f32 %v314_v42, %v2108_v27  ;;  %v204_v27 = vld [vmem:[%s2550_s1 + $0x60] sm:$0xff] }
  0xb0   : > { %1772 = vmatprep.mubr.msk.f32.mxu1 %vm347_vm0, %v343_v41  ;;  %v1886_v52 = vpack.c.bf16 %v206_v51, %v204_v27  ;;  %1885 = vmatprep.subr.bf16.mxu1 %v1884_v50 }
  0xb1   : > { %v345_v47 = vmax.f32 %v329_v44, 0.0  ;;  %v346_v48 = vmax.f32 %v330_v46, 0.0  ;;  %1793 = vmatmul.mubr.msk.f32.gmra.mrb[8].mxu0 %vm825_vm1, %v2063_v15 }
  0xb2   : > { %1887 = vmatpush1.bf16.msra.mxu1 %v1886_v52  ;;  %1795 = vmatprep.mubr.msk.f32.mxu0 %vm825_vm1, %v2074_v18 }
  0xb3   : > { %1773 = vmatmul.mubr.msk.f32.gmra.mrb[12].mxu1 %vm347_vm0, %v344_v45 }
  0xb4   : > { %1775 = vmatprep.mubr.msk.f32.mxu1 %vm347_vm0, %v345_v47 }
  0xb5   : > { %1796 = vmatmul.mubr.msk.f32.gmra.mrb[10].mxu0 %vm825_vm1, %v2071_v17 }
  0xb6   : > { %1798 = vmatprep.mubr.msk.f32.mxu0 %vm825_vm1, %v2082_v20 }
  0xb7   : > { %1776 = vmatmul.mubr.msk.f32.gmra.mrb[14].mxu1 %vm347_vm0, %v346_v48 }
  0xb8   : > { %728 = vmatprep.mubr.f32.mxu1 %v1978_v53 }
  0xb9   : > { %1799 = vmatmul.mubr.msk.f32.gmra.mrb[12].mxu0 %vm825_vm1, %v2079_v19 }
  0xba   : > { %1801 = vmatprep.mubr.msk.f32.mxu0 %vm825_vm1, %v2090_v22 }
  0xbd   : > { %1802 = vmatmul.mubr.msk.f32.gmra.mrb[14].mxu0 %vm825_vm1, %v2087_v21 }
 0x16e   : > { %v1756_v2 = vpop.f32.mrb[0].mxu1 }
 0x16f   : > { %v468_v3 = vadd.f32 %v1756_v2, %v2215_v1  ;;  %v462_v4 = vpop.f32.mrb[1].mxu1 }
 0x170   : > { %v463_v5 = vadd.f32 %v462_v4, %v2215_v1 }
 0x171   : > { %v542_v8 = vmul.f32 0.5, %v468_v3 }
 0x172   : > { %v541_v13 = vmul.f32 0.5, %v463_v5  ;;  %v1759_v14 = vpop.f32.mrb[2].mxu1 }
 0x173   : > { %1937 = vtanh.f32 %v542_v8  ;;  %v472_v15 = vpop.f32.mrb[3].mxu1  ;;  %v478_v16 = vadd.f32 %v1759_v14, %v2215_v1 }
 0x174   : > { %1939 = vtanh.f32 %v541_v13  ;;  %v473_v17 = vadd.f32 %v472_v15, %v2215_v1 }
 0x175   : > { %v544_v21 = vmul.f32 0.5, %v478_v16 }
 0x176   : > { %v543_v18 = vmul.f32 0.5, %v473_v17  ;;  %v1762_v19 = vpop.f32.mrb[4].mxu1 }
 0x177   : > { %v482_v20 = vpop.f32.mrb[5].mxu1  ;;  %v488_v57 = vadd.f32 %v1762_v19, %v2215_v1 }
 0x178   : > { %1941 = vtanh.f32 %v543_v18  ;;  %v483_v22 = vadd.f32 %v482_v20, %v2215_v1 }
 0x179   : > { %1943 = vtanh.f32 %v544_v21  ;;  %v546_v0 = vmul.f32 0.5, %v488_v57 }
 0x17a   : > { %v1765_v55 = vpop.f32.mrb[6].mxu1  ;;  %v545_v58 = vmul.f32 0.5, %v483_v22 }
 0x17b   : > { %v492_v56 = vpop.f32.mrb[7].mxu1  ;;  %v498_v23 = vadd.f32 %v1765_v55, %v2215_v1 }
 0x17c   : > { %1945 = vtanh.f32 %v545_v58  ;;  %v493_v6 = vadd.f32 %v492_v56, %v2215_v1 }
 0x17d   : > { %v1938_v59 = vpop.eup %1937  ;;  %1947 = vtanh.f32 %v546_v0  ;;  %v548_v32 = vmul.f32 0.5, %v498_v23 }
 0x17e   : > { %v1940_v60 = vpop.eup %1939  ;;  %v1768_v61 = vpop.f32.mrb[8].mxu1  ;;  %v574_v7 = vmul.f32 0.5, %v1938_v59  ;;  %v547_v24 = vmul.f32 0.5, %v493_v6 }
 0x17f   : > { %v573_v62 = vmul.f32 0.5, %v1940_v60  ;;  %v502_v63 = vpop.f32.mrb[9].mxu1  ;;  %v508_v39 = vadd.f32 %v1768_v61, %v2215_v1 }
 0x180   : > { %v590_v25 = vadd.f32 0.5, %v574_v7  ;;  %1949 = vtanh.f32 %v547_v24  ;;  %v503_v33 = vadd.f32 %v502_v63, %v2215_v1 }
 0x181   : > { %v589_v9 = vadd.f32 0.5, %v573_v62  ;;  %1951 = vtanh.f32 %v548_v32  ;;  %v550_v44 = vmul.f32 0.5, %v508_v39 }
 0x182   : > { %v1942_v10 = vpop.eup %1941  ;;  %v1771_v11 = vpop.f32.mrb[10].mxu1  ;;  %v549_v40 = vmul.f32 0.5, %v503_v33 }
 0x183   : > { %v512_v12 = vpop.f32.mrb[11].mxu1  ;;  %1601 = vmatmul.mubr.msk.f32.vlgmr.msra.gmra.mrb[16].mxu1 %vm347_vm0, %v589_v9  ;;  %v575_v28 = vmul.f32 0.5, %v1942_v10  ;;  %v1944_v29 = vpop.eup %1943  ;;  %v518_v26 = vadd.f32 %v1771_v11, %v2215_v1 }
 0x184   : > { %734 = vmatprep.mubr.f32.mxu1 %v1978_v53  ;;  %v576_v34 = vmul.f32 0.5, %v1944_v29  ;;  %1953 = vtanh.f32 %v549_v40  ;;  %v513_v45 = vadd.f32 %v512_v12, %v2215_v1 }
 0x185   : > { %v591_v35 = vadd.f32 0.5, %v575_v28  ;;  %1955 = vtanh.f32 %v550_v44  ;;  %v552_v52 = vmul.f32 0.5, %v518_v26  ;;  %v212_v44 = vld [vmem:[%s2550_s1 + $0xc0] sm:$0xff]  ;;  %v215_v26 = vld [vmem:[%s2550_s1 + $0xf0] sm:$0xff] }
 0x186   : > { %v1774_v30 = vpop.f32.mrb[12].mxu1  ;;  %v1946_v36 = vpop.eup %1945  ;;  %v592_v41 = vadd.f32 0.5, %v576_v34  ;;  %v551_v49 = vmul.f32 0.5, %v513_v45 }
 0x187   : > { %v522_v31 = vpop.f32.mrb[13].mxu1  ;;  %1602 = vmatmul.mubr.msk.f32.gmra.mrb[18].mxu1 %vm347_vm0, %v590_v25  ;;  %v577_v42 = vmul.f32 0.5, %v1946_v36  ;;  %v1948_v43 = vpop.eup %1947  ;;  %v528_v5 = vadd.f32 %v1774_v30, %v2215_v1 }
 0x188   : > { %740 = vmatprep.mubr.f32.mxu1 %v1978_v53  ;;  %v578_v46 = vmul.f32 0.5, %v1948_v43  ;;  %1957 = vtanh.f32 %v551_v49  ;;  %v523_v54 = vadd.f32 %v522_v31, %v2215_v1  ;;  %v1782_v25 = vpop.f32.mrb[0].mxu0  ;;  %v211_v43 = vld [vmem:[%s2550_s1 + $0xb0] sm:$0xff] }
 0x189   : > { %v593_v47 = vadd.f32 0.5, %v577_v42  ;;  %1959 = vtanh.f32 %v552_v52  ;;  %v554_v16 = vmul.f32 0.5, %v528_v5  ;;  %v924_v28 = vpop.f32.mrb[1].mxu0  ;;  %v210_v42 = vld [vmem:[%s2550_s1 + $0xa0] sm:$0xff]  ;;  %v217_v52 = vld [vmem:[%s2550_s1 + $0x110] sm:$0xff] }
 0x18a   : > { %v1777_v37 = vpop.f32.mrb[14].mxu1  ;;  %v1950_v48 = vpop.eup %1949  ;;  %v594_v50 = vadd.f32 0.5, %v578_v46  ;;  %v553_v8 = vmul.f32 0.5, %v523_v54  ;;  %v1888_v45 = vpack.c.bf16 %v211_v43, %v210_v42  ;;  %v213_v46 = vld [vmem:[%s2550_s1 + $0xd0] sm:$0xff] }
 0x18b   : > { %v532_v38 = vpop.f32.mrb[15].mxu1  ;;  %1603 = vmatmul.mubr.msk.f32.gmra.mrb[20].mxu1 %vm347_vm0, %v591_v35  ;;  %v579_v27 = vmul.f32 0.5, %v1950_v48  ;;  %v1952_v51 = vpop.eup %1951  ;;  %v538_v21 = vadd.f32 %v1777_v37, %v2215_v1  ;;  %v214_v48 = vld [vmem:[%s2550_s1 + $0xe0] sm:$0xff] }
 0x18c   : > { %746 = vmatprep.mubr.f32.mxu1 %v1978_v53  ;;  %v580_v2 = vmul.f32 0.5, %v1952_v51  ;;  %1961 = vtanh.f32 %v553_v8  ;;  %v533_v17 = vadd.f32 %v532_v38, %v2215_v1  ;;  %v2264_v29 = vpop.f32.mrb[2].mxu0  ;;  %1889 = vmatprep.subr.bf16.mxu0 %v1888_v45  ;;  %v1896_v49 = vpack.c.bf16 %v215_v26, %v214_v48  ;;  %v216_v51 = vld [vmem:[%s2550_s1 + $0x100] sm:$0xff] }
 0x18d   : > { %v595_v3 = vadd.f32 0.5, %v579_v27  ;;  %1963 = vtanh.f32 %v554_v16  ;;  %v556_v58 = vmul.f32 0.5, %v538_v21  ;;  %v934_v30 = vpop.f32.mrb[3].mxu0  ;;  %1891 = vmatpush3.bf16.msra.mxu0 %v1888_v45  ;;  %v1900_v54 = vpack.c.bf16 %v217_v52, %v216_v51 }
 0x18e   : > { %v1954_v4 = vpop.eup %1953  ;;  %v596_v13 = vadd.f32 0.5, %v580_v2  ;;  %v555_v22 = vmul.f32 0.5, %v533_v17  ;;  %v2266_v31 = vpop.f32.mrb[4].mxu0 }
 0x18f   : > { %1604 = vmatmul.mubr.msk.f32.gmra.mrb[22].mxu1 %vm347_vm0, %v592_v41  ;;  %v581_v14 = vmul.f32 0.5, %v1954_v4  ;;  %v1956_v15 = vpop.eup %1955  ;;  %v2268_v32 = vpop.f32.mrb[5].mxu0 }
 0x190   : > { %752 = vmatprep.mubr.f32.mxu1 %v1978_v53  ;;  %v582_v18 = vmul.f32 0.5, %v1956_v15  ;;  %1965 = vtanh.f32 %v555_v22  ;;  %v2270_v33 = vpop.f32.mrb[6].mxu0 }
 0x191   : > { %v597_v19 = vadd.f32 0.5, %v581_v14  ;;  %1967 = vtanh.f32 %v556_v58  ;;  %v2272_v34 = vpop.f32.mrb[7].mxu0 }
 0x192   : > { %v1958_v20 = vpop.eup %1957  ;;  %v598_v55 = vadd.f32 0.5, %v582_v18  ;;  %v2274_v35 = vpop.f32.mrb[8].mxu0 }
 0x193   : > { %1605 = vmatmul.mubr.msk.f32.gmra.mrb[24].mxu1 %vm347_vm0, %v593_v47  ;;  %v583_v56 = vmul.f32 0.5, %v1958_v20  ;;  %v1960_v57 = vpop.eup %1959  ;;  %v2276_v36 = vpop.f32.mrb[9].mxu0  ;;  %v1892_v47 = vpack.c.bf16 %v213_v46, %v212_v44 }
 0x194   : > { %758 = vmatprep.mubr.f32.mxu1 %v1978_v53  ;;  %v584_v59 = vmul.f32 0.5, %v1960_v57 }
 0x195   : > { %v599_v60 = vadd.f32 0.5, %v583_v56  ;;  %1893 = vmatprep.subr.bf16.mxu0 %v1892_v47 }
 0x196   : > { %v1962_v61 = vpop.eup %1961  ;;  %v600_v1 = vadd.f32 0.5, %v584_v59  ;;  %1895 = vmatpush3.bf16.msra.mxu0 %v1892_v47 }
 0x197   : > { %1606 = vmatmul.mubr.msk.f32.gmra.mrb[26].mxu1 %vm347_vm0, %v594_v50  ;;  %v585_v62 = vmul.f32 0.5, %v1962_v61  ;;  %v1964_v63 = vpop.eup %1963  ;;  %1897 = vmatprep.subr.bf16.mxu0 %v1896_v49  ;;  %v606_v50 = vlaneseq }
 0x198   : > { %764 = vmatprep.mubr.f32.mxu1 %v1978_v53  ;;  %v586_v0 = vmul.f32 0.5, %v1964_v63 }
 0x199   : > { %v601_v6 = vadd.f32 0.5, %v585_v62  ;;  %v607_v27 = vshrl.u32 %v606_v50, 7 }
 0x19a   : > { %v1966_v7 = vpop.eup %1965  ;;  %v602_v9 = vadd.f32 0.5, %v586_v0  ;;  %1899 = vmatpush3.bf16.msra.mxu0 %v1896_v49 }
 0x19b   : > { %1607 = vmatmul.mubr.msk.f32.gmra.mrb[28].mxu1 %vm347_vm0, %v595_v3  ;;  %v587_v10 = vmul.f32 0.5, %v1966_v7  ;;  %v1968_v11 = vpop.eup %1967  ;;  %1901 = vmatprep.subr.bf16.mxu0 %v1900_v54  ;;  %v608_v2 = vsub.s32 0, %v607_v27  ;;  %v1584_v3 = vld [vmem:[%s2551_s2 + $0x3] ss:$8 sm:$0x3]  ;;  %v612_v4 = vsub.s32 1, %v607_v27 }
 0x19c   : > { %770 = vmatprep.mubr.f32.mxu1 %v1978_v53  ;;  %v588_v12 = vmul.f32 0.5, %v1968_v11 }
 0x19d   : > { %v603_v23 = vadd.f32 0.5, %v587_v10  ;;  %v2317_v5 = vrot.slane %v1584_v3, %v608_v2  ;;  %v2319_v8 = vrot.slane %v1584_v3, %v612_v4 }
 0x19e   : > { %v604_v24 = vadd.f32 0.5, %v588_v12  ;;  %1903 = vmatpush3.bf16.msra.mxu0 %v1900_v54 }
 0x19f   : > { %1608 = vmatmul.mubr.msk.f32.gmra.mrb[30].mxu1 %vm347_vm0, %v596_v13 }
 0x1a0   : > { %776 = vmatprep.mubr.f32.mxu1 %v1978_v53 }
 0x1a3   : > { %1609 = vmatmul.mubr.msk.f32.gmra.mrb[32].mxu1 %vm347_vm0, %v597_v19 }
 0x1a4   : > { %782 = vmatprep.mubr.f32.mxu1 %v1978_v53 }
 0x1a7   : > { %1610 = vmatmul.mubr.msk.f32.gmra.mrb[34].mxu1 %vm347_vm0, %v598_v55 }
 0x1a8   : > { %788 = vmatprep.mubr.f32.mxu1 %v1978_v53 }
 0x1ab   : > { %1611 = vmatmul.mubr.msk.f32.gmra.mrb[36].mxu1 %vm347_vm0, %v599_v60 }
 0x1ac   : > { %794 = vmatprep.mubr.f32.mxu1 %v1978_v53 }
 0x1af   : > { %1612 = vmatmul.mubr.msk.f32.gmra.mrb[38].mxu1 %vm347_vm0, %v600_v1 }
 0x1b0   : > { %800 = vmatprep.mubr.f32.mxu1 %v1978_v53 }
 0x1b3   : > { %1613 = vmatmul.mubr.msk.f32.gmra.mrb[40].mxu1 %vm347_vm0, %v601_v6 }
 0x1b4   : > { %806 = vmatprep.mubr.f32.mxu1 %v1978_v53 }
 0x1b7   : > { %1614 = vmatmul.mubr.msk.f32.gmra.mrb[42].mxu1 %vm347_vm0, %v602_v9 }
 0x1b8   : > { %812 = vmatprep.mubr.f32.mxu1 %v1978_v53 }
 0x1bb   : > { %1615 = vmatmul.mubr.msk.f32.gmra.mrb[44].mxu1 %vm347_vm0, %v603_v23 }
 0x1bc   : > { %818 = vmatprep.mubr.f32.mxu1 %v1978_v53  ;;  %v2278_v53 = vpop.f32.mrb[10].mxu0 }
 0x1bd   : > { %v2280_v37 = vpop.f32.mrb[11].mxu0 }
 0x1be   : > { %v2282_v38 = vpop.f32.mrb[12].mxu0 }
 0x1bf   : > { %1616 = vmatmul.mubr.msk.f32.gmra.mrb[46].mxu1 %vm347_vm0, %v604_v24  ;;  %v2284_v39 = vpop.f32.mrb[13].mxu0 }
 0x1c0   : > { %v2286_v40 = vpop.f32.mrb[14].mxu0 }
 0x1c1   : > { %v2288_v41 = vpop.f32.mrb[15].mxu0 }
 0x256   : > { %v730_v13 = vpop.f32.mrb[16].mxu1 }
 0x257   : > { %v2322_v14 = vadd.f32 %v730_v13, %v2317_v5  ;;  %v732_v15 = vpop.f32.mrb[17].mxu1 }
 0x258   : > { %v733_v16 = vadd.f32 %v732_v15, %v2319_v8 }
 0x259   : > { %1035 = vrot.lane.b32.xlu0 %v2322_v14, %s1979_s21 }
 0x25a   : > { %v2327_v17 = vmul.f32 %v924_v28, %v733_v16  ;;  %v736_v18 = vpop.f32.mrb[18].mxu1  ;;  %v209_v28 = vld [vmem:[%s2550_s1 + $0x90] sm:$0xff] }
 0x25b   : > { %v2330_v19 = vadd.f32 %v736_v18, %v2317_v5  ;;  %v738_v20 = vpop.f32.mrb[19].mxu1 }
 0x25c   : > { %v739_v21 = vadd.f32 %v738_v20, %v2319_v8 }
 0x25d   : > { %1037 = vrot.lane.b32.xlu1 %v2330_v19, %s1979_s21 }
 0x25e   : > { %v2335_v22 = vmul.f32 %v1782_v25, %v739_v21  ;;  %v742_v55 = vpop.f32.mrb[20].mxu1  ;;  %v208_v25 = vld [vmem:[%s2550_s1 + $0x80] sm:$0xff] }
 0x25f   : > { %v2338_v56 = vadd.f32 %v742_v55, %v2317_v5  ;;  %v744_v57 = vpop.f32.mrb[21].mxu1 }
 0x260   : > { %v745_v58 = vadd.f32 %v744_v57, %v2319_v8 }
 0x261   : > { %1039 = vrot.lane.b32.xlu0 %v2338_v56, %s1979_s21 }
 0x262   : > { %v2343_v59 = vmul.f32 %v934_v30, %v745_v58  ;;  %v748_v60 = vpop.f32.mrb[22].mxu1 }
 0x263   : > { %v2346_v61 = vadd.f32 %v748_v60, %v2317_v5  ;;  %v750_v1 = vpop.f32.mrb[23].mxu1 }
 0x264   : > { %v751_v62 = vadd.f32 %v750_v1, %v2319_v8 }
 0x265   : > { %1041 = vrot.lane.b32.xlu1 %v2346_v61, %s1979_s21 }
 0x266   : > { %v2352_v63 = vmul.f32 %v2264_v29, %v751_v62  ;;  %v754_v0 = vpop.f32.mrb[24].mxu1  ;;  %v2375_v29 = vpack.c.bf16 %v209_v28, %v208_v25 }
 0x267   : > { %v2355_v6 = vadd.f32 %v754_v0, %v2317_v5  ;;  %v756_v7 = vpop.f32.mrb[25].mxu1 }
 0x268   : > { %v757_v9 = vadd.f32 %v756_v7, %v2319_v8  ;;  %1905 = vmatprep.subr.bf16.mxu0 %v2375_v29 }
 0x269   : > { %1043 = vrot.lane.b32.xlu0 %v2355_v6, %s1979_s21 }
 0x26a   : > { %v2361_v10 = vmul.f32 %v2268_v32, %v757_v9  ;;  %v760_v11 = vpop.f32.mrb[26].mxu1 }
 0x26b   : > { %v2364_v12 = vadd.f32 %v760_v11, %v2317_v5  ;;  %v762_v23 = vpop.f32.mrb[27].mxu1 }
 0x26c   : > { %v763_v24 = vadd.f32 %v762_v23, %v2319_v8 }
 0x26d   : > { %1045 = vrot.lane.b32.xlu1 %v2364_v12, %s1979_s21 }
 0x26e   : > { %v2378_v30 = vmul.f32 %v2266_v31, %v763_v24  ;;  %v766_v32 = vpop.f32.mrb[28].mxu1 }
 0x26f   : > { %v2381_v42 = vadd.f32 %v766_v32, %v2317_v5  ;;  %v768_v43 = vpop.f32.mrb[29].mxu1 }
 0x270   : > { %v769_v44 = vadd.f32 %v768_v43, %v2319_v8 }
 0x271   : > { %1047 = vrot.lane.b32.xlu0 %v2381_v42, %s1979_s21 }
 0x272   : > { %v2388_v45 = vmul.f32 %v2272_v34, %v769_v44  ;;  %v772_v46 = vpop.f32.mrb[30].mxu1 }
 0x273   : > { %v2391_v47 = vadd.f32 %v772_v46, %v2317_v5  ;;  %v774_v31 = vpop.f32.mrb[31].mxu1 }
 0x274   : > { %v775_v48 = vadd.f32 %v774_v31, %v2319_v8 }
 0x275   : > { %1049 = vrot.lane.b32.xlu1 %v2391_v47, %s1979_s21 }
 0x276   : > { %v2397_v26 = vmul.f32 %v2270_v33, %v775_v48  ;;  %v778_v49 = vpop.f32.mrb[32].mxu1 }
 0x277   : > { %v2400_v50 = vadd.f32 %v778_v49, %v2317_v5  ;;  %v780_v27 = vpop.f32.mrb[33].mxu1 }
 0x278   : > { %v781_v34 = vadd.f32 %v780_v27, %v2319_v8 }
 0x279   : > { %1051 = vrot.lane.b32.xlu0 %v2400_v50, %s1979_s21 }
 0x27a   : > { %v2406_v51 = vmul.f32 %v2276_v36, %v781_v34  ;;  %v784_v52 = vpop.f32.mrb[34].mxu1 }
 0x27b   : > { %v2409_v54 = vadd.f32 %v784_v52, %v2317_v5  ;;  %v786_v2 = vpop.f32.mrb[35].mxu1 }
 0x27c   : > { %v787_v33 = vadd.f32 %v786_v2, %v2319_v8 }
 0x27d   : > { %1053 = vrot.lane.b32.xlu1 %v2409_v54, %s1979_s21 }
 0x27e   : > { %v2415_v3 = vmul.f32 %v2274_v35, %v787_v33  ;;  %v790_v4 = vpop.f32.mrb[36].mxu1 }
 0x27f   : > { %v2418_v13 = vadd.f32 %v790_v4, %v2317_v5  ;;  %v792_v15 = vpop.f32.mrb[37].mxu1 }
 0x280   : > { %v793_v36 = vadd.f32 %v792_v15, %v2319_v8 }
 0x281   : > { %1055 = vrot.lane.b32.xlu0 %v2418_v13, %s1979_s21 }
 0x282   : > { %v2424_v16 = vmul.f32 %v2280_v37, %v793_v36  ;;  %v796_v18 = vpop.f32.mrb[38].mxu1 }
 0x283   : > { %v2427_v20 = vadd.f32 %v796_v18, %v2317_v5  ;;  %v798_v21 = vpop.f32.mrb[39].mxu1 }
 0x284   : > { %v799_v35 = vadd.f32 %v798_v21, %v2319_v8 }
 0x285   : > { %1057 = vrot.lane.b32.xlu1 %v2427_v20, %s1979_s21 }
 0x286   : > { %v2433_v55 = vmul.f32 %v2278_v53, %v799_v35  ;;  %v802_v57 = vpop.f32.mrb[40].mxu1 }
 0x287   : > { %v803_v58 = vadd.f32 %v802_v57, %v2317_v5  ;;  %v804_v60 = vpop.f32.mrb[41].mxu1 }
 0x288   : > { %v805_v37 = vadd.f32 %v804_v60, %v2319_v8 }
 0x289   : > { %1059 = vrot.lane.b32.xlu0 %v803_v58, %s1979_s21 }
 0x28a   : > { %v2439_v1 = vmul.f32 %v2284_v39, %v805_v37  ;;  %v808_v62 = vpop.f32.mrb[42].mxu1 }
 0x28b   : > { %v809_v0 = vadd.f32 %v808_v62, %v2317_v5  ;;  %v810_v7 = vpop.f32.mrb[43].mxu1 }
 0x28c   : > { %v811_v9 = vadd.f32 %v810_v7, %v2319_v8 }
 0x28d   : > { %1061 = vrot.lane.b32.xlu1 %v809_v0, %s1979_s21 }
 0x28e   : > { %v2445_v53 = vmul.f32 %v2282_v38, %v811_v9  ;;  %v814_v11 = vpop.f32.mrb[44].mxu1 }
 0x28f   : > { %v815_v23 = vadd.f32 %v814_v11, %v2317_v5  ;;  %v816_v24 = vpop.f32.mrb[45].mxu1 }
 0x290   : > { %v817_v25 = vadd.f32 %v816_v24, %v2319_v8 }
 0x291   : > { %1063 = vrot.lane.b32.xlu0 %v815_v23, %s1979_s21 }
 0x292   : > { %v2451_v39 = vmul.f32 %v2288_v41, %v817_v25  ;;  %v820_v28 = vpop.f32.mrb[46].mxu1 }
 0x293   : > { %v821_v32 = vadd.f32 %v820_v28, %v2317_v5  ;;  %v822_v43 = vpop.f32.mrb[47].mxu1 }
 0x294   : > { %v823_v44 = vadd.f32 %v822_v43, %v2319_v8 }
 0x295   : > { %1065 = vrot.lane.b32.xlu1 %v821_v32, %s1979_s21 }
 0x296   : > { %v2457_v38 = vmul.f32 %v2286_v40, %v823_v44 }
 0x2cb   : > { %v1036_v46 = vpop.permute.xlu0 %1035 }
 0x2cc   : > { %v1083_v31 = vmul.f32 %v1036_v46, %v2322_v14 }
 0x2ce   : > { %1820 = vmatprep.mubr.msk.f32.mxu0 %vm1099_vm2, %v1083_v31 }
 0x2cf   : > { %v1038_v48 = vpop.permute.xlu1 %1037 }
 0x2d0   : > { %v1084_v41 = vmul.f32 %v1038_v48, %v2330_v19 }
 0x2d2   : > { %1821 = vmatmul.mubr.msk.f32.vlgmr.msra.gmra.mrb[16].mxu0 %vm1099_vm2, %v1084_v41 }
 0x2d3   : > { %v1040_v5 = vpop.permute.xlu0 %1039  ;;  %1907 = vmatpush3.bf16.msra.mxu0 %v2375_v29 }
 0x2d4   : > { %v1085_v8 = vmul.f32 %v1040_v5, %v2338_v56 }
 0x2d6   : > { %1823 = vmatprep.mubr.msk.f32.mxu0 %vm1099_vm2, %v1085_v8 }
 0x2d7   : > { %v1042_v40 = vpop.permute.xlu1 %1041 }
 0x2d8   : > { %v1086_v49 = vmul.f32 %v1042_v40, %v2346_v61 }
 0x2da   : > { %1824 = vmatmul.mubr.msk.f32.gmra.mrb[18].mxu0 %vm1099_vm2, %v1086_v49 }
 0x2db   : > { %v1044_v14 = vpop.permute.xlu0 %1043 }
 0x2dc   : > { %v1087_v27 = vmul.f32 %v1044_v14, %v2355_v6 }
 0x2de   : > { %1826 = vmatprep.mubr.msk.f32.mxu0 %vm1099_vm2, %v1087_v27 }
 0x2df   : > { %v1046_v19 = vpop.permute.xlu1 %1045 }
 0x2e0   : > { %v1088_v34 = vmul.f32 %v1046_v19, %v2364_v12 }
 0x2e2   : > { %1827 = vmatmul.mubr.msk.f32.gmra.mrb[20].mxu0 %vm1099_vm2, %v1088_v34 }
 0x2e3   : > { %v1048_v29 = vpop.permute.xlu0 %1047 }
 0x2e4   : > { %v1089_v56 = vmul.f32 %v1048_v29, %v2381_v42 }
 0x2e6   : > { %1829 = vmatprep.mubr.msk.f32.mxu0 %vm1099_vm2, %v1089_v56 }
 0x2e7   : > { %v1050_v52 = vpop.permute.xlu1 %1049 }
 0x2e8   : > { %v1090_v61 = vmul.f32 %v1050_v52, %v2391_v47 }
 0x2ea   : > { %1830 = vmatmul.mubr.msk.f32.gmra.mrb[22].mxu0 %vm1099_vm2, %v1090_v61 }
 0x2eb   : > { %v1052_v2 = vpop.permute.xlu0 %1051 }
 0x2ec   : > { %v1091_v6 = vmul.f32 %v1052_v2, %v2400_v50 }
 0x2ee   : > { %1832 = vmatprep.mubr.msk.f32.mxu0 %vm1099_vm2, %v1091_v6 }
 0x2ef   : > { %v1054_v33 = vpop.permute.xlu1 %1053 }
 0x2f0   : > { %v1092_v12 = vmul.f32 %v1054_v33, %v2409_v54 }
 0x2f2   : > { %1833 = vmatmul.mubr.msk.f32.gmra.mrb[24].mxu0 %vm1099_vm2, %v1092_v12 }
 0x2f3   : > { %v1056_v4 = vpop.permute.xlu0 %1055 }
 0x2f4   : > { %v1093_v42 = vmul.f32 %v1056_v4, %v2418_v13 }
 0x2f6   : > { %1835 = vmatprep.mubr.msk.f32.mxu0 %vm1099_vm2, %v1093_v42 }
 0x2f7   : > { %v1058_v15 = vpop.permute.xlu1 %1057 }
 0x2f8   : > { %v1094_v47 = vmul.f32 %v1058_v15, %v2427_v20 }
 0x2fa   : > { %1836 = vmatmul.mubr.msk.f32.gmra.mrb[26].mxu0 %vm1099_vm2, %v1094_v47 }
 0x2fb   : > { %v1060_v36 = vpop.permute.xlu0 %1059 }
 0x2fc   : > { %v1095_v18 = vmul.f32 %v1060_v36, %v803_v58 }
 0x2fe   : > { %1838 = vmatprep.mubr.msk.f32.mxu0 %vm1099_vm2, %v1095_v18 }
 0x2ff   : > { %v1062_v50 = vpop.permute.xlu1 %1061 }
 0x300   : > { %v1096_v21 = vmul.f32 %v1062_v50, %v809_v0 }
 0x302   : > { %1839 = vmatmul.mubr.msk.f32.gmra.mrb[28].mxu0 %vm1099_vm2, %v1096_v21 }
 0x303   : > { %v1064_v54 = vpop.permute.xlu0 %1063 }
 0x304   : > { %v1097_v35 = vmul.f32 %v1064_v54, %v815_v23 }
 0x306   : > { %1841 = vmatprep.mubr.msk.f32.mxu0 %vm1099_vm2, %v1097_v35 }
 0x307   : > { %v1066_v13 = vpop.permute.xlu1 %1065 }
 0x308   : > { %v1098_v57 = vmul.f32 %v1066_v13, %v821_v32 }
 0x30a   : > { %1842 = vmatmul.mubr.msk.f32.gmra.mrb[30].mxu0 %vm1099_vm2, %v1098_v57 }
 0x30b   : > { %1848 = vmatprep.mubr.msk.f32.mxu0 %vm1293_vm3, %v2327_v17  ;;  %v195_v17 = vld [vmem:[%s2551_s2 + $0x4] ss:$0 sm:$0xff] }
 0x30e   : > { %1849 = vmatmul.mubr.msk.f32.vlgmr.msra.gmra.mrb[16].mxu0 %vm1293_vm3, %v2335_v22 }
 0x30f   : > { %1851 = vmatprep.mubr.msk.f32.mxu0 %vm1293_vm3, %v2343_v59 }
 0x312   : > { %1852 = vmatmul.mubr.msk.f32.gmra.mrb[18].mxu0 %vm1293_vm3, %v2352_v63 }
 0x313   : > { %1854 = vmatprep.mubr.msk.f32.mxu0 %vm1293_vm3, %v2361_v10 }
 0x316   : > { %1855 = vmatmul.mubr.msk.f32.gmra.mrb[20].mxu0 %vm1293_vm3, %v2378_v30 }
 0x317   : > { %1857 = vmatprep.mubr.msk.f32.mxu0 %vm1293_vm3, %v2388_v45 }
 0x31a   : > { %1858 = vmatmul.mubr.msk.f32.gmra.mrb[22].mxu0 %vm1293_vm3, %v2397_v26 }
 0x31b   : > { %1860 = vmatprep.mubr.msk.f32.mxu0 %vm1293_vm3, %v2406_v51 }
 0x31e   : > { %1861 = vmatmul.mubr.msk.f32.gmra.mrb[24].mxu0 %vm1293_vm3, %v2415_v3 }
 0x31f   : > { %1863 = vmatprep.mubr.msk.f32.mxu0 %vm1293_vm3, %v2424_v16 }
 0x322   : > { %1864 = vmatmul.mubr.msk.f32.gmra.mrb[26].mxu0 %vm1293_vm3, %v2433_v55 }
 0x323   : > { %1866 = vmatprep.mubr.msk.f32.mxu0 %vm1293_vm3, %v2439_v1 }
 0x326   : > { %1867 = vmatmul.mubr.msk.f32.gmra.mrb[28].mxu0 %vm1293_vm3, %v2445_v53 }
 0x327   : > { %1869 = vmatprep.mubr.msk.f32.mxu0 %vm1293_vm3, %v2451_v39 }
 0x32a   : > { %1870 = vmatmul.mubr.msk.f32.gmra.mrb[30].mxu0 %vm1293_vm3, %v2457_v38 }
 0x3e1   : > { %v1850_v22 = vpop.f32.mrb[16].mxu0 }
 0x3e2   : > { %v1488_v59 = vadd.f32 %v1850_v22, %v195_v17  ;;  %v1408_v63 = vpop.f32.mrb[17].mxu0 }
 0x3e3   : > { %v1487_v10 = vadd.f32 %v1408_v63, %v195_v17 }
 0x3e4   : > { %1504 = vst [vmem:[%s2528_s30 + $0x8] sm:$0xff] %v1488_v59 }
 0x3e5   : > { %1503 = vst [vmem:[%s2528_s30] sm:$0xff] %v1487_v10  ;;  %v1853_v30 = vpop.f32.mrb[18].mxu0 }
 0x3e6   : > { %v1490_v45 = vadd.f32 %v1853_v30, %v195_v17  ;;  %v1418_v26 = vpop.f32.mrb[19].mxu0 }
 0x3e7   : > { %v1489_v51 = vadd.f32 %v1418_v26, %v195_v17 }
 0x3e8   : > { %1506 = vst [vmem:[%s2528_s30 + $0x18] sm:$0xff] %v1490_v45 }
 0x3e9   : > { %1505 = vst [vmem:[%s2528_s30 + $0x10] sm:$0xff] %v1489_v51  ;;  %v1856_v3 = vpop.f32.mrb[20].mxu0 }
 0x3ea   : > { %v1492_v16 = vadd.f32 %v1856_v3, %v195_v17  ;;  %v1428_v20 = vpop.f32.mrb[21].mxu0 }
 0x3eb   : > { %v1491_v55 = vadd.f32 %v1428_v20, %v195_v17 }
 0x3ec   : > { %1508 = vst [vmem:[%s2528_s30 + $0x28] sm:$0xff] %v1492_v16 }
 0x3ed   : > { %1507 = vst [vmem:[%s2528_s30 + $0x20] sm:$0xff] %v1491_v55  ;;  %v1859_v58 = vpop.f32.mrb[22].mxu0 }
 0x3ee   : > { %v1494_v60 = vadd.f32 %v1859_v58, %v195_v17  ;;  %v1438_v37 = vpop.f32.mrb[23].mxu0 }
 0x3ef   : > { %v1493_v1 = vadd.f32 %v1438_v37, %v195_v17 }
 0x3f0   : > { %1510 = vst [vmem:[%s2528_s30 + $0x38] sm:$0xff] %v1494_v60 }
 0x3f1   : > { %1509 = vst [vmem:[%s2528_s30 + $0x30] sm:$0xff] %v1493_v1  ;;  %v1862_v62 = vpop.f32.mrb[24].mxu0 }
 0x3f2   : > { %v1496_v0 = vadd.f32 %v1862_v62, %v195_v17  ;;  %v1448_v7 = vpop.f32.mrb[25].mxu0 }
 0x3f3   : > { %v1495_v9 = vadd.f32 %v1448_v7, %v195_v17 }
 0x3f4   : > { %1512 = vst [vmem:[%s2528_s30 + $0x48] sm:$0xff] %v1496_v0 }
 0x3f5   : > { %1511 = vst [vmem:[%s2528_s30 + $0x40] sm:$0xff] %v1495_v9  ;;  %v1865_v53 = vpop.f32.mrb[26].mxu0 }
 0x3f6   : > { %v1498_v11 = vadd.f32 %v1865_v53, %v195_v17  ;;  %v1458_v23 = vpop.f32.mrb[27].mxu0 }
 0x3f7   : > { %v1497_v24 = vadd.f32 %v1458_v23, %v195_v17 }
 0x3f8   : > { %1514 = vst [vmem:[%s2528_s30 + $0x58] sm:$0xff] %v1498_v11 }
 0x3f9   : > { %1513 = vst [vmem:[%s2528_s30 + $0x50] sm:$0xff] %v1497_v24  ;;  %v1868_v25 = vpop.f32.mrb[28].mxu0 }
 0x3fa   : > { %v1500_v39 = vadd.f32 %v1868_v25, %v195_v17  ;;  %v1468_v28 = vpop.f32.mrb[29].mxu0 }
 0x3fb   : > { %v1499_v32 = vadd.f32 %v1468_v28, %v195_v17 }
 0x3fc   : > { %1516 = vst [vmem:[%s2528_s30 + $0x68] sm:$0xff] %v1500_v39 }
 0x3fd   : > { %1515 = vst [vmem:[%s2528_s30 + $0x60] sm:$0xff] %v1499_v32  ;;  %v1871_v43 = vpop.f32.mrb[30].mxu0 }
 0x3fe   : > { %v1502_v44 = vadd.f32 %v1871_v43, %v195_v17  ;;  %v1478_v38 = vpop.f32.mrb[31].mxu0 }
 0x3ff   : > { %v1501_v46 = vadd.f32 %v1478_v38, %v195_v17 }
 0x400   : > { %1518 = vst [vmem:[%s2528_s30 + $0x78] sm:$0xff] %v1502_v44 }
 0x401   : > { %1517 = vst [vmem:[%s2528_s30 + $0x70] sm:$0xff] %v1501_v46 }
 0x402 PF: > { %s13_s12 = sadd.s32 1, %s1975_s12  }
 0x403   : > { %p10_p4 = scmp.ge.s32.totalorder %s13_s12, 4  }
 0x405   :  { %12 = sbr.rel (!%p10_p4) target bundleno = 1 (0x1), region = 63 }

</bundles_post_ra>
